<compile_context>
chip_gen: v6e
topology: v6e:2x2x1
jax: 0.10.0
libtpu: 0.0.40
codegen_flags: <defaults>
</compile_context>

<pallas_src>
import jax
import jax.numpy as jnp
from jax.experimental import pallas as pl
from jax.experimental.pallas import tpu as pltpu


def _reg_l1_kernel(ind_ref,      # (B, K) i32     SMEM (scalar prefetch)
                   mask_ref,     # (Bt, K, 1) f32 VMEM
                   target_ref,   # (Bt, K, C)     VMEM (native dtype)
                   feat_ref,     # (Bt, HW, C)    VMEM (native dtype) - streamed slab(s)
                   num_ref,      # (1, 1, 1) f32  VMEM out (per-step partial numerator)
                   pred_buf):    # (K, C) f32     VMEM scratch (gather destination)
    i = pl.program_id(0)
    Bt, K, C = target_ref.shape

    acc = jnp.zeros((), jnp.float32)
    for bi in range(Bt):                       # static unroll over batches in this step
        b = i * Bt + bi                        # global batch index (for SMEM ind lookup)

        # In-VMEM gather: K contiguous (1, C) rows via dynamic sublane slices.
        # These are register-level vld/vst copies -- no DMA descriptors at all.
        for k in range(K):                     # K is small & static -> unrolled
            idx = ind_ref[b, k]
            pred_buf[pl.ds(k, 1), :] = (
                feat_ref[bi, pl.ds(idx, 1), :].astype(jnp.float32))

        pred = pred_buf[...]                               # (K, C) f32
        t = target_ref[bi].astype(jnp.float32)             # (K, C)
        m = mask_ref[bi]                                   # (K, 1), broadcasts over C
        # (pred - t) * m == pred*m - t*m exactly for nonnegative (0/1) masks.
        acc = acc + jnp.sum(jnp.abs(pred - t) * m)

    num_ref[...] = acc.reshape(1, 1, 1)


def reg_l1_loss(output, mask, ind, target):
    """output: (B, C, H, W); mask: (B, K); ind: (B, K) int; target: (B, K, C)."""
    B, C, H, W = output.shape
    K = ind.shape[1]
    HW = H * W

    # Same layout change PyTorch's _transpose_and_gather_feat performs, but in
    # the network's NATIVE dtype (no full-map float32 up-cast).
    feat = jnp.transpose(output, (0, 2, 3, 1)).reshape(B, HW, C)

    # Clamp indices so padded / masked-out slots (e.g. -1) cannot slice OOB.
    ind32 = jnp.clip(ind.astype(jnp.int32), 0, HW - 1)

    mask_f = mask.astype(jnp.float32)
    mask3 = mask_f.reshape(B, K, 1)

    # Denominator depends only on mask -> plain JAX (kernel emits numerator only).
    den = jnp.float32(C) * jnp.sum(mask_f)

    # Choose Bt (batches per grid step): amortize per-step overhead on single-TC
    # chips, keep >= 2 steps when B >= 2 (v7x megacore), and keep the
    # double-buffered feature slabs well inside scoped VMEM on every generation.
    slab_bytes = HW * C * feat.dtype.itemsize
    vmem_budget = 8 * 1024 * 1024                      # for the 2x-buffered slabs
    max_bt = max(1, vmem_budget // max(1, 2 * slab_bytes))
    cap = max(1, B // 2)
    bt = 1
    for d in range(1, B + 1):
        if B % d == 0 and d <= max_bt and d <= cap:
            bt = d
    nb = B // bt

    cp_kwargs = dict(dimension_semantics=("parallel",))
    vmem_need = 2 * bt * slab_bytes + (2 << 20)
    if vmem_need > (12 << 20):
        cp_kwargs["vmem_limit_bytes"] = min(vmem_need, 64 << 20)

    num_part = pl.pallas_call(
        _reg_l1_kernel,
        out_shape=jax.ShapeDtypeStruct((nb, 1, 1), jnp.float32),
        grid_spec=pltpu.PrefetchScalarGridSpec(
            num_scalar_prefetch=1,                     # ind -> SMEM
            grid=(nb,),
            in_specs=[
                pl.BlockSpec((bt, K, 1), lambda i, ind: (i, 0, 0)),    # mask
                pl.BlockSpec((bt, K, C), lambda i, ind: (i, 0, 0)),    # target
                pl.BlockSpec((bt, HW, C), lambda i, ind: (i, 0, 0)),   # feature slab(s)
            ],
            out_specs=pl.BlockSpec((1, 1, 1), lambda i, ind: (i, 0, 0)),
            scratch_shapes=[
                pltpu.VMEM((K, C), jnp.float32),       # gathered pred rows
            ]),
        compiler_params=pltpu.CompilerParams(**cp_kwargs),
    )(ind32, mask3, target, feat)

    num = jnp.sum(num_part)
    return num / (den + jnp.float32(0.0001))


def _reference(output, mask, ind, target):
    B, C, H, W = output.shape
    feat = jnp.transpose(output, (0, 2, 3, 1)).reshape(B, H * W, C)
    pred = jnp.take_along_axis(feat, ind.astype(jnp.int32)[:, :, None], axis=1)  # (B, K, C)
    m = jnp.broadcast_to(mask.astype(jnp.float32)[:, :, None], pred.shape)
    loss = jnp.sum(jnp.abs(pred * m - target * m))
    return loss / (jnp.sum(m) + 0.0001)


if __name__ == "__main__":
    B, C, H, W, K = 2, 4, 16, 16, 8
    key = jax.random.PRNGKey(0)
    k1, k2, k3, k4 = jax.random.split(key, 4)

    output = jax.random.normal(k1, (B, C, H, W), dtype=jnp.float32)
    target = jax.random.normal(k2, (B, K, C), dtype=jnp.float32)
    ind = jax.random.randint(k3, (B, K), 0, H * W, dtype=jnp.int32)
    mask = (jax.random.uniform(k4, (B, K)) > 0.3).astype(jnp.float32)

    loss = reg_l1_loss(output, mask, ind, target)
    loss = jax.block_until_ready(loss)

    ref = _reference(output, mask, ind, target)
    assert jnp.allclose(loss, ref, rtol=1e-5, atol=1e-6), (loss, ref)

    print("KERNEL_OK")
</pallas_src>

<mosaic_0001>
module attributes {stable_mosaic.version = 11 : i64} {
  func.func @_reg_l1_kernel(%arg0: i32, %arg1: memref<2x8xi32, #tpu.memory_space<smem>>, %arg2: memref<1x8x1xf32, #tpu.memory_space<vmem>>, %arg3: memref<1x8x4xf32, #tpu.memory_space<vmem>>, %arg4: memref<1x256x4xf32, #tpu.memory_space<vmem>>, %arg5: memref<1x1x1xf32, #tpu.memory_space<vmem>>, %arg6: memref<8x4xf32, #tpu.memory_space<vmem>>) attributes {dimension_semantics = [#tpu.dimension_semantics<parallel>], iteration_bounds = array<i64: 2>, scalar_prefetch = 1 : i64, scratch_operands = 1 : i64, tpu.core_type = #tpu.core_type<tc>, window_params = [{transform_indices = @transform_0, window_bounds = array<i64: 1, 8, 1>}, {transform_indices = @transform_1, window_bounds = array<i64: 1, 8, 4>}, {transform_indices = @transform_2, window_bounds = array<i64: 1, 256, 4>}, {transform_indices = @transform_3, window_bounds = array<i64: 1, 1, 1>}]} {
    %c1_i32 = arith.constant 1 : i32
    %0 = arith.muli %arg0, %c1_i32 : i32
    %c0_i32 = arith.constant 0 : i32
    %1 = arith.addi %0, %c0_i32 : i32
    %2 = arith.index_cast %1 : i32 to index
    %c0 = arith.constant 0 : index
    %3 = memref.load %arg1[%2, %c0] : memref<2x8xi32, #tpu.memory_space<smem>>
    %c0_0 = arith.constant 0 : index
    %4 = arith.index_cast %3 : i32 to index
    %c0_1 = arith.constant 0 : index
    %5 = vector.load %arg4[%c0_0, %4, %c0_1] : memref<1x256x4xf32, #tpu.memory_space<vmem>>, vector<1x1x4xf32>
    %6 = vector.shape_cast %5 : vector<1x1x4xf32> to vector<1x4xf32>
    %c0_2 = arith.constant 0 : index
    %c0_3 = arith.constant 0 : index
    %7 = vector.load %arg6[%c0_2, %c0_3] : memref<8x4xf32, #tpu.memory_space<vmem>>, vector<1x4xf32>
    tpu.vector_store %arg6[%c0_2, %c0_3], %6 {strides = array<i32>} : memref<8x4xf32, #tpu.memory_space<vmem>>, vector<1x4xf32>,
    %8 = arith.index_cast %1 : i32 to index
    %c1 = arith.constant 1 : index
    %9 = memref.load %arg1[%8, %c1] : memref<2x8xi32, #tpu.memory_space<smem>>
    %c0_4 = arith.constant 0 : index
    %10 = arith.index_cast %9 : i32 to index
    %c0_5 = arith.constant 0 : index
    %11 = vector.load %arg4[%c0_4, %10, %c0_5] : memref<1x256x4xf32, #tpu.memory_space<vmem>>, vector<1x1x4xf32>
    %12 = vector.shape_cast %11 : vector<1x1x4xf32> to vector<1x4xf32>
    %c1_6 = arith.constant 1 : index
    %c0_7 = arith.constant 0 : index
    %13 = vector.load %arg6[%c1_6, %c0_7] : memref<8x4xf32, #tpu.memory_space<vmem>>, vector<1x4xf32>
    tpu.vector_store %arg6[%c1_6, %c0_7], %12 {strides = array<i32>} : memref<8x4xf32, #tpu.memory_space<vmem>>, vector<1x4xf32>,
    %14 = arith.index_cast %1 : i32 to index
    %c2 = arith.constant 2 : index
    %15 = memref.load %arg1[%14, %c2] : memref<2x8xi32, #tpu.memory_space<smem>>
    %c0_8 = arith.constant 0 : index
    %16 = arith.index_cast %15 : i32 to index
    %c0_9 = arith.constant 0 : index
    %17 = vector.load %arg4[%c0_8, %16, %c0_9] : memref<1x256x4xf32, #tpu.memory_space<vmem>>, vector<1x1x4xf32>
    %18 = vector.shape_cast %17 : vector<1x1x4xf32> to vector<1x4xf32>
    %c2_10 = arith.constant 2 : index
    %c0_11 = arith.constant 0 : index
    %19 = vector.load %arg6[%c2_10, %c0_11] : memref<8x4xf32, #tpu.memory_space<vmem>>, vector<1x4xf32>
    tpu.vector_store %arg6[%c2_10, %c0_11], %18 {strides = array<i32>} : memref<8x4xf32, #tpu.memory_space<vmem>>, vector<1x4xf32>,
    %20 = arith.index_cast %1 : i32 to index
    %c3 = arith.constant 3 : index
    %21 = memref.load %arg1[%20, %c3] : memref<2x8xi32, #tpu.memory_space<smem>>
    %c0_12 = arith.constant 0 : index
    %22 = arith.index_cast %21 : i32 to index
    %c0_13 = arith.constant 0 : index
    %23 = vector.load %arg4[%c0_12, %22, %c0_13] : memref<1x256x4xf32, #tpu.memory_space<vmem>>, vector<1x1x4xf32>
    %24 = vector.shape_cast %23 : vector<1x1x4xf32> to vector<1x4xf32>
    %c3_14 = arith.constant 3 : index
    %c0_15 = arith.constant 0 : index
    %25 = vector.load %arg6[%c3_14, %c0_15] : memref<8x4xf32, #tpu.memory_space<vmem>>, vector<1x4xf32>
    tpu.vector_store %arg6[%c3_14, %c0_15], %24 {strides = array<i32>} : memref<8x4xf32, #tpu.memory_space<vmem>>, vector<1x4xf32>,
    %26 = arith.index_cast %1 : i32 to index
    %c4 = arith.constant 4 : index
    %27 = memref.load %arg1[%26, %c4] : memref<2x8xi32, #tpu.memory_space<smem>>
    %c0_16 = arith.constant 0 : index
    %28 = arith.index_cast %27 : i32 to index
    %c0_17 = arith.constant 0 : index
    %29 = vector.load %arg4[%c0_16, %28, %c0_17] : memref<1x256x4xf32, #tpu.memory_space<vmem>>, vector<1x1x4xf32>
    %30 = vector.shape_cast %29 : vector<1x1x4xf32> to vector<1x4xf32>
    %c4_18 = arith.constant 4 : index
    %c0_19 = arith.constant 0 : index
    %31 = vector.load %arg6[%c4_18, %c0_19] : memref<8x4xf32, #tpu.memory_space<vmem>>, vector<1x4xf32>
    tpu.vector_store %arg6[%c4_18, %c0_19], %30 {strides = array<i32>} : memref<8x4xf32, #tpu.memory_space<vmem>>, vector<1x4xf32>,
    %32 = arith.index_cast %1 : i32 to index
    %c5 = arith.constant 5 : index
    %33 = memref.load %arg1[%32, %c5] : memref<2x8xi32, #tpu.memory_space<smem>>
    %c0_20 = arith.constant 0 : index
    %34 = arith.index_cast %33 : i32 to index
    %c0_21 = arith.constant 0 : index
    %35 = vector.load %arg4[%c0_20, %34, %c0_21] : memref<1x256x4xf32, #tpu.memory_space<vmem>>, vector<1x1x4xf32>
    %36 = vector.shape_cast %35 : vector<1x1x4xf32> to vector<1x4xf32>
    %c5_22 = arith.constant 5 : index
    %c0_23 = arith.constant 0 : index
    %37 = vector.load %arg6[%c5_22, %c0_23] : memref<8x4xf32, #tpu.memory_space<vmem>>, vector<1x4xf32>
    tpu.vector_store %arg6[%c5_22, %c0_23], %36 {strides = array<i32>} : memref<8x4xf32, #tpu.memory_space<vmem>>, vector<1x4xf32>,
    %38 = arith.index_cast %1 : i32 to index
    %c6 = arith.constant 6 : index
    %39 = memref.load %arg1[%38, %c6] : memref<2x8xi32, #tpu.memory_space<smem>>
    %c0_24 = arith.constant 0 : index
    %40 = arith.index_cast %39 : i32 to index
    %c0_25 = arith.constant 0 : index
    %41 = vector.load %arg4[%c0_24, %40, %c0_25] : memref<1x256x4xf32, #tpu.memory_space<vmem>>, vector<1x1x4xf32>
    %42 = vector.shape_cast %41 : vector<1x1x4xf32> to vector<1x4xf32>
    %c6_26 = arith.constant 6 : index
    %c0_27 = arith.constant 0 : index
    %43 = vector.load %arg6[%c6_26, %c0_27] : memref<8x4xf32, #tpu.memory_space<vmem>>, vector<1x4xf32>
    tpu.vector_store %arg6[%c6_26, %c0_27], %42 {strides = array<i32>} : memref<8x4xf32, #tpu.memory_space<vmem>>, vector<1x4xf32>,
    %44 = arith.index_cast %1 : i32 to index
    %c7 = arith.constant 7 : index
    %45 = memref.load %arg1[%44, %c7] : memref<2x8xi32, #tpu.memory_space<smem>>
    %c0_28 = arith.constant 0 : index
    %46 = arith.index_cast %45 : i32 to index
    %c0_29 = arith.constant 0 : index
    %47 = vector.load %arg4[%c0_28, %46, %c0_29] : memref<1x256x4xf32, #tpu.memory_space<vmem>>, vector<1x1x4xf32>
    %48 = vector.shape_cast %47 : vector<1x1x4xf32> to vector<1x4xf32>
    %c7_30 = arith.constant 7 : index
    %c0_31 = arith.constant 0 : index
    %49 = vector.load %arg6[%c7_30, %c0_31] : memref<8x4xf32, #tpu.memory_space<vmem>>, vector<1x4xf32>
    tpu.vector_store %arg6[%c7_30, %c0_31], %48 {strides = array<i32>} : memref<8x4xf32, #tpu.memory_space<vmem>>, vector<1x4xf32>,
    %c0_32 = arith.constant 0 : index
    %c0_33 = arith.constant 0 : index
    %50 = vector.load %arg6[%c0_32, %c0_33] : memref<8x4xf32, #tpu.memory_space<vmem>>, vector<8x4xf32>
    %c0_34 = arith.constant 0 : index
    %c0_35 = arith.constant 0 : index
    %c0_36 = arith.constant 0 : index
    %51 = vector.load %arg3[%c0_34, %c0_35, %c0_36] : memref<1x8x4xf32, #tpu.memory_space<vmem>>, vector<1x8x4xf32>
    %52 = vector.shape_cast %51 : vector<1x8x4xf32> to vector<8x4xf32>
    %c0_37 = arith.constant 0 : index
    %c0_38 = arith.constant 0 : index
    %c0_39 = arith.constant 0 : index
    %53 = vector.load %arg2[%c0_37, %c0_38, %c0_39] : memref<1x8x1xf32, #tpu.memory_space<vmem>>, vector<1x8x1xf32>
    %54 = vector.shape_cast %53 : vector<1x8x1xf32> to vector<8x1xf32>
    %55 = arith.subf %50, %52 : vector<8x4xf32>
    %56 = math.absf %55 : vector<8x4xf32>
    %57 = vector.broadcast %54 : vector<8x1xf32> to vector<8x4xf32>
    %58 = arith.mulf %56, %57 : vector<8x4xf32>
    %59 = vector.shape_cast %58 : vector<8x4xf32> to vector<1x8x4xf32>
    %cst = arith.constant dense<0.000000e+00> : vector<1xf32>
    %60 = vector.multi_reduction <add>, %59, %cst [1, 2] : vector<1x8x4xf32> to vector<1xf32>
    %61 = vector.shape_cast %60 : vector<1xf32> to vector<1x1x1xf32>
    %62 = vector.extract %61[0, 0, 0] : f32 from vector<1x1x1xf32>
    %cst_40 = arith.constant 0.000000e+00 : f32
    %63 = arith.addf %cst_40, %62 : f32
    %64 = vector.broadcast %63 : f32 to vector<1x1x1xf32>
    %c0_41 = arith.constant 0 : index
    %c0_42 = arith.constant 0 : index
    %c0_43 = arith.constant 0 : index
    %65 = vector.load %arg5[%c0_41, %c0_42, %c0_43] : memref<1x1x1xf32, #tpu.memory_space<vmem>>, vector<1x1x1xf32>
    tpu.vector_store %arg5[%c0_41, %c0_42, %c0_43], %64 {strides = array<i32>} : memref<1x1x1xf32, #tpu.memory_space<vmem>>, vector<1x1x1xf32>,
    return
  }
  func.func @transform_0(%arg0: i32, %arg1: memref<2x8xi32, #tpu.memory_space<smem>>) -> (i32, i32, i32) {
    %c0_i32 = arith.constant 0 : i32
    %c0_i32_0 = arith.constant 0 : i32
    %c0_i32_1 = arith.constant 0 : i32
    return %arg0, %c0_i32, %c0_i32_0 : i32, i32, i32
  }
  func.func @transform_1(%arg0: i32, %arg1: memref<2x8xi32, #tpu.memory_space<smem>>) -> (i32, i32, i32) {
    %c0_i32 = arith.constant 0 : i32
    %c0_i32_0 = arith.constant 0 : i32
    %c0_i32_1 = arith.constant 0 : i32
    return %arg0, %c0_i32, %c0_i32_0 : i32, i32, i32
  }
  func.func @transform_2(%arg0: i32, %arg1: memref<2x8xi32, #tpu.memory_space<smem>>) -> (i32, i32, i32) {
    %c0_i32 = arith.constant 0 : i32
    %c0_i32_0 = arith.constant 0 : i32
    %c0_i32_1 = arith.constant 0 : i32
    return %arg0, %c0_i32, %c0_i32_0 : i32, i32, i32
  }
  func.func @transform_3(%arg0: i32, %arg1: memref<2x8xi32, #tpu.memory_space<smem>>) -> (i32, i32, i32) {
    %c0_i32 = arith.constant 0 : i32
    %c0_i32_0 = arith.constant 0 : i32
    %c0_i32_1 = arith.constant 0 : i32
    return %arg0, %c0_i32, %c0_i32_0 : i32, i32, i32
  }
}

</mosaic_0001>

<bundles_post_ra>
// kernel: tpu_custom_call.1
= control target key start
LH: loop header
LB: loop body
LE: loop exit
PB: predicated region body
PF: predicated region fallthrough
CT: control target
= control target key end

     0   :  { %s492_s0 = inlined_call_operand.vmem [shape: s32[2,8], index: 0, kind: input, shape index: {}]   ;;  %s493_s1 = inlined_call_operand.vmem [shape: f32[2,8,1], index: 1, kind: input, shape index: {}]   ;;  %s494_s2 = inlined_call_operand.vmem [shape: f32[2,8,4], index: 2, kind: input, shape index: {}]   ;;  %s495_s3 = inlined_call_operand.vmem [shape: f32[2,256,4], index: 3, kind: input, shape index: {}]   ;;  %s496_s4 = inlined_call_operand.vmem [shape: f32[2,1,1], index: 4, kind: output, shape index: {}]  }
   0x1   :  { %s9_s17 = sshll.u32 %s492_s0, 4  ;;  %s10_s17 = int_to_ptr.vmem [resolvable:$true] %s9_s17 }
   0x2   :  { %s380_s18 = scalar_lea.vmem %s10_s17, 32  ;;  %p385_p1 = scmp.lt.s32.totalorder %s10_s17, %s10_s17 }
   0x3   :  { %p381_p0 = scmp.ne.s32.totalorder %s10_s17, %s380_s18  ;;  %p386_p2 = scmp.lt.s32.totalorder %s380_s18, %s380_s18 }
   0x5   :  { %p387_p3 = por %p386_p2, %p385_p1 }
   0x7   :  { %p388_p4 = pnand %p387_p3, %p381_p0 }
   0x9   :  { %391 = shalt.err (!%p388_p4)  }
   0xa   :  { %s402_s19 = smov [#allocation4]  }
   0xb   :  { %12 = dma.vmem_to_smem %s10_s17, 32, %s402_s19, [#allocation3] }
   0xc   :  { %396 = dma.done.wait [#allocation3], 32 }
   0xd   :  { %397 = vsyncadd [#allocation3], 4294967264 }
   0xe   :  { %14 = sfence }
   0xf   :  { %s432_s20 = smov 0  }
  0x10 LB: > { %s354_s0 = sadd.s32 4294967295, %s400_s20   ;;  %p358_p5 = scmp.ge.s32.totalorder %s400_s20, 1  ;;  %s400_s20 = sphi %s432_s20, %s20_s20  }
  0x11   : > { %p162_p6 = scmp.lt.s32.totalorder %s400_s20, 3 }
  0x13   : > { %p163_p7 = pnand %p358_p5, %p162_p6 }
  0x14   : > { %p192_p8 = scmp.lt.s32.totalorder (!%p163_p7), %s354_s0, 1  ;;  %s440_s21 = sshll.u32 (!%p163_p7), %s354_s0, 7 }
  0x15   : > { %166 = sbr.rel (%p163_p7) target bundleno = 359 (0x167), region = 32  ;;  %s209_s22 = sld [smem:[#allocation4 + %s440_s21]] (!%p163_p7) }
  0x16   : > { %s214_s23 = sadd.s32 (!%p163_p7), 1, %s440_s21  ;;  %s219_s25 = sadd.s32 (!%p163_p7), 2, %s440_s21 }
  0x17   : > { %s215_s24 = sld [smem:[#allocation4 + %s214_s23]] (!%p163_p7)  ;;  %s224_s10 = sadd.s32 (!%p163_p7), 3, %s440_s21 }
  0x18   : > { %s220_s8 = sld [smem:[#allocation4 + %s219_s25]] (!%p163_p7)  ;;  %s229_s12 = sadd.s32 (!%p163_p7), 4, %s440_s21 }
  0x19   : > { %s225_s11 = sld [smem:[#allocation4 + %s224_s10]] (!%p163_p7)  ;;  %s234_s15 = sadd.s32 (!%p163_p7), 5, %s440_s21 }
  0x1a   : > { %v403_v0 = vmov 0   ;;  %s498_s0 = smov (!%p192_p8, %s354_s0), 1  ;;  %vm212_vm0 = vcmask 24576   ;;  %s230_s14 = sld [smem:[#allocation4 + %s229_s12]]  ;;  %vm260_vm1 = vcmask 31744   ;;  %vm273_vm2 = vcmask 0  }
  0x1b   : > { %379 = vset.pattern.permute.xlu0 %v403_v0  ;;  %s359_s26 = sshll.u32 %s498_s0, 3  ;;  %s366_s27 = sshll.u32 %s498_s0, 8 }
  0x1c   : > { %s195_s30 = scalar_lea.vmem %s493_s1, %s359_s26  ;;  %s457_s7 = scalar_lea.vmem %s495_s3, %s366_s27 }
  0x1d   : > { %v251_v1 = vld [vmem:[%s195_s30] sm:$0xff]  ;;  %s210_s9 = scalar_lea.vmem %s457_s7, %s209_s22  ;;  %s216_s13 = scalar_lea.vmem %s457_s7, %s215_s24 }
  0x1e   : > { %256 = vperm.xlu0 %379, %v251_v1   ;;  %v211_v2 = vld [vmem:[%s210_s9] sm:$0x1]  ;;  %s239_s16 = sadd.s32 6, %s440_s21  ;;  %s235_s17 = sld [smem:[#allocation4 + %s234_s15]] }
  0x1f   : > { %213 = vst.msk [vmem:[#allocation2] sm:$0x1] %vm212_vm0, %v211_v2  ;;  %v217_v3 = vld [vmem:[%s216_s13] sm:$0x1]  ;;  %s244_s18 = sadd.s32 7, %s440_s21  ;;  %s221_s19 = scalar_lea.vmem %s457_s7, %s220_s8 }
  0x20   : > { %218 = vst.msk [vmem:[#allocation2 + $0x1] sm:$0x1] %vm212_vm0, %v217_v3  ;;  %s240_s22 = sld [smem:[#allocation4 + %s239_s16]]  ;;  %v222_v4 = vld [vmem:[%s221_s19] sm:$0x1]  ;;  %s226_s25 = scalar_lea.vmem %s457_s7, %s225_s11 }
  0x21   : > { %s245_s23 = sld [smem:[#allocation4 + %s244_s18]]  ;;  %223 = vst.msk [vmem:[#allocation2 + $0x2] sm:$0x1] %vm212_vm0, %v222_v4  ;;  %v227_v5 = vld [vmem:[%s226_s25] sm:$0x1]  ;;  %s231_s24 = scalar_lea.vmem %s457_s7, %s230_s14 }
  0x22   : > { %228 = vst.msk [vmem:[#allocation2 + $0x3] sm:$0x1] %vm212_vm0, %v227_v5  ;;  %v232_v6 = vld [vmem:[%s231_s24] sm:$0x1]  ;;  %s199_s5 = scalar_lea.vmem %s494_s2, %s359_s26 }
  0x23   : > { %233 = vst.msk [vmem:[#allocation2 + $0x4] sm:$0x1] %vm212_vm0, %v232_v6  ;;  %v250_v10 = vld [vmem:[%s199_s5] sm:$0xff] }
  0x24   : > { %s236_s27 = scalar_lea.vmem %s457_s7, %s235_s17 }
  0x25   : > { %v237_v7 = vld [vmem:[%s236_s27] sm:$0x1] }
  0x26   : > { %s241_s28 = scalar_lea.vmem %s457_s7, %s240_s22  ;;  %238 = vst.msk [vmem:[#allocation2 + $0x5] sm:$0x1] %vm212_vm0, %v237_v7 }
  0x27   : > { %v242_v8 = vld [vmem:[%s241_s28] sm:$0x1]  ;;  %s246_s21 = scalar_lea.vmem %s457_s7, %s245_s23  ;;  %s207_s7 = scalar_lea.vmem %s496_s4, %s498_s0 }
  0x28   : > { %243 = vst.msk [vmem:[#allocation2 + $0x6] sm:$0x1] %vm212_vm0, %v242_v8  ;;  %v247_v9 = vld [vmem:[%s246_s21] sm:$0x1] }
  0x29   : > { %248 = vst.msk [vmem:[#allocation2 + $0x7] sm:$0x1] %vm212_vm0, %v247_v9 }
  0x30   : > { %v249_v11 = vld [vmem:[#allocation2] sm:$0xff] }
  0x31   : > { %v252_v12 = vsub.f32 %v249_v11, %v250_v10 }
  0x33   : > { %v253_v13 = vand.u32 2147483647, %v252_v12 }
  0x99   : > { %v257_v14 = vpop.permute.xlu0 %256 }
  0x9a   : > { %v259_v15 = vmul.f32 %v257_v14, %v253_v13 }
  0x9c   : > { %v261_v16 = vsel %vm260_vm1, %v259_v15, 0.0 }
  0x9d   : > { %262 = vadd.xlane.f32.xlu0 %v261_v16 }
 0x126   : > { %v263_v17 = vpop.xlane.xlu0 %262 }
 0x127   : > { %v264_v18 = vrot.slane %v263_v17, 4 }
 0x129   : > { %v265_v19 = vadd.f32 %v264_v18, %v263_v17 }
 0x12b   : > { %v266_v20 = vrot.slane %v265_v19, 2 }
 0x12d   : > { %v267_v21 = vadd.f32 %v266_v20, %v265_v19 }
 0x12f   : > { %v268_v22 = vrot.slane %v267_v21, 1 }
 0x131   : > { %v269_v23 = vadd.f32 %v268_v22, %v267_v21 }
 0x133   : > { %367 = vpush %v269_v23 }
 0x164   : > { %s368_s8 = spop %367 }
 0x165   : > { %v272_v24 = vstv %s368_s8 }
 0x166   : > { %274 = vst.msk [vmem:[%s207_s7] sm:$0x1] %vm273_vm2, %v272_v24 }
 0x167 PF: > { %s20_s20 = sadd.s32 1, %s400_s20  }
 0x168   : > { %p17_p9 = scmp.ge.s32.totalorder %s20_s20, 4  }
 0x16a   :  { %19 = sbr.rel (!%p17_p9) target bundleno = 16 (0x10), region = 76 }

</bundles_post_ra>
